<compile_context>
chip_gen: v7x
topology: tpu7x:2x2x1
jax: 0.10.0
libtpu: 0.0.40
codegen_flags: <defaults>
</compile_context>

<pallas_src>
import functools

import jax
import jax.numpy as jnp
from jax.experimental import pallas as pl
from jax.experimental.pallas import tpu as pltpu


def _glu_stack_kernel(x_ref, w_ref, b_ref, o_ref, buf_ref, *, K, H, BG):
    """Full n_layers GLU causal-conv stack for one block of BG batch elements.

    x_ref  : (BG, T, C)        f32 input block
    w_ref  : (L, K*C, 2C)      bf16 merged conv_a|conv_b im2col weights (VMEM-resident)
    b_ref  : (L, 1, 2C)        f32 merged biases (VMEM-resident)
    o_ref  : (BG, T, C)        f32 output block
    buf_ref: (2, BG*(H+T), C)  bf16 ping-pong activation scratch; per batch element,
                               rows [0, H) are the causal zero halo (H >= K-1,
                               aligned to the bf16 sublane tile).
    """
    T = x_ref.shape[1]
    C = x_ref.shape[2]
    L = w_ref.shape[0]
    S = H + T                                  # scratch rows per batch element

    # In-VMEM causal padding: zero the halos once; they are never overwritten.
    if H > 0:
        for s in range(2):
            for b in range(BG):
                buf_ref[s, b * S:b * S + H, :] = jnp.zeros((H, C), jnp.bfloat16)

    # Load the input block into ping-pong slot 0 (single bf16 cast, aligned stores).
    for b in range(BG):
        buf_ref[0, b * S + H:b * S + S, :] = x_ref[b, :, :].astype(jnp.bfloat16)

    for layer in range(L):                     # static unroll; activations stay in VMEM
        src = layer % 2
        dst = 1 - src

        # Build the im2col matrix (BG*T, K*C): one aligned load per batch element,
        # K shifted register-level slices of it, taps on the lane axis.
        rows = []
        for b in range(BG):
            seg = buf_ref[src, b * S:(b + 1) * S, :]            # (S, C) aligned load
            taps = [seg[H - (K - 1) + k:H - (K - 1) + k + T, :] for k in range(K)]
            rows.append(taps[0] if K == 1 else jnp.concatenate(taps, axis=1))
        x_cols = rows[0] if BG == 1 else jnp.concatenate(rows, axis=0)  # (BG*T, K*C)

        # One MXU dot per layer (bf16 x bf16 -> f32 accumulation), bias folded once.
        hab = jnp.dot(x_cols, w_ref[layer, :, :],
                      preferred_element_type=jnp.float32) + b_ref[layer, :, :]

        # GLU in f32 (sigmoid on the EUP).
        y = hab[:, :C] * jax.nn.sigmoid(hab[:, C:])

        if layer == L - 1:
            for b in range(BG):
                o_ref[b, :, :] = y[b * T:(b + 1) * T, :].astype(o_ref.dtype)
        else:
            for b in range(BG):                                 # bf16 store, tile-aligned
                buf_ref[dst, b * S + H:b * S + S, :] = (
                    y[b * T:(b + 1) * T, :].astype(jnp.bfloat16))


def _fused_glu_stack(x_btc, w_all, b_all, kernel_size, batch_block=None):
    """x_btc: (B, T, C) f32 -> (B, T, C) f32; all layers fused in one pallas_call."""
    B, T, C = x_btc.shape
    L, KC, C2 = w_all.shape
    K = kernel_size
    assert KC == K * C and C2 == 2 * C
    BG = B if batch_block is None else batch_block
    assert B % BG == 0
    # Causal halo, rounded up to the bf16 sublane tile (16 rows) so all scratch
    # stores stay tile-aligned (loads of the shifted taps come from one aligned
    # segment load and are sliced in registers).
    H = 16 * pl.cdiv(K - 1, 16)
    S = H + T

    kernel = functools.partial(_glu_stack_kernel, K=K, H=H, BG=BG)
    return pl.pallas_call(
        kernel,
        out_shape=jax.ShapeDtypeStruct((B, T, C), x_btc.dtype),
        grid=(B // BG,),
        in_specs=[
            pl.BlockSpec((BG, T, C), lambda g: (g, 0, 0)),
            # Constant index_maps: weights/biases are DMA'd once and stay resident.
            # TODO(synk): at production C, mark these pipeline_mode=pl.Buffered(1)
            #             (or stream per layer over an 'arbitrary' grid axis) so the
            #             pipeline does not double-buffer invariant operands against
            #             v7x's 64 MiB VMEM.
            pl.BlockSpec((L, KC, C2), lambda g: (0, 0, 0)),
            pl.BlockSpec((L, 1, C2), lambda g: (0, 0, 0)),
        ],
        out_specs=pl.BlockSpec((BG, T, C), lambda g: (g, 0, 0)),
        scratch_shapes=[
            pltpu.VMEM((2, BG * S, C), jnp.bfloat16),   # bf16 ping-pong acts + zero halos
        ],
        compiler_params=pltpu.CompilerParams(
            dimension_semantics=("parallel",)),         # batch blocks across TCs on v7x
    )(x_btc, w_all, b_all)


@functools.partial(jax.jit, static_argnames=("kernel_size",))
def language_module_forward(x_bct, w_all, b_all, *, kernel_size):
    """x_bct: (B, C, T) — PyTorch Conv1d layout. Returns (B, C, T)."""
    # TODO(synk): at production T (>=128) move these transposes into the kernel
    #             ((B,C,T) blocks, XLU transpose in VMEM) so the output store is
    #             lane-dense in T and the two XLA HBM transpose passes disappear;
    #             at T=16 / C=32 both layouts are narrow masked stores, so the
    #             wrapper transposes are kept for lowering simplicity.
    x = jnp.transpose(x_bct, (0, 2, 1))                    # -> (B, T, C)
    y = _fused_glu_stack(x, w_all, b_all, kernel_size)
    return jnp.transpose(y, (0, 2, 1))                     # -> (B, C, T)


class LanguageModulePallas:
    """JAX/Pallas equivalent of the PyTorch LanguageModule."""

    def __init__(self, embedding_dim=32, n_layers=3, kernel_size=3, key=None):
        self.embedding_dim = embedding_dim
        self.n_layers = n_layers
        self.kernel_size = kernel_size
        if key is None:
            key = jax.random.PRNGKey(0)

        C, K = embedding_dim, kernel_size
        bound = 1.0 / float(C * K) ** 0.5       # PyTorch Conv1d default init
        w_layers, b_layers = [], []
        for _ in range(n_layers):
            key, ka, kba, kb, kbb = jax.random.split(key, 5)
            # Per-tap (C_in, C_out) layout == torch_weight.permute(2, 1, 0)
            wa = jax.random.uniform(ka, (K, C, C), jnp.float32, -bound, bound)
            ba = jax.random.uniform(kba, (C,), jnp.float32, -bound, bound)
            wb = jax.random.uniform(kb, (K, C, C), jnp.float32, -bound, bound)
            bb = jax.random.uniform(kbb, (C,), jnp.float32, -bound, bound)
            # Merge conv_a | conv_b along output channels, then reshape to the
            # im2col layout: rows k*C:(k+1)*C of (K*C, 2C) hold tap k.
            w_layers.append(jnp.concatenate([wa, wb], axis=-1).reshape(K * C, 2 * C))
            b_layers.append(jnp.concatenate([ba, bb])[None, :])
        # TODO(synk): for C < 128, pack G = 128 // C batch/time groups side by side on
        #             the lane axis with block-diagonal (G*K*C, G*2C) weights to fill
        #             vregs / the 256-wide MXU and get unmasked full-width stores.
        self.w_all = jnp.stack(w_layers).astype(jnp.bfloat16)   # (L, K*C, 2C) bf16
        self.b_all = jnp.stack(b_layers)                        # (L, 1, 2C)   f32

    def __call__(self, x_bct):
        return language_module_forward(x_bct, self.w_all, self.b_all,
                                       kernel_size=self.kernel_size)


def _reference_forward(x_bct, w_all, b_all, kernel_size):
    """Plain-JAX reference mirroring the kernel numerics
    (bf16 im2col matmul inputs, f32 accumulation, f32 GLU)."""
    K = kernel_size
    x = jnp.transpose(x_bct, (0, 2, 1)).astype(jnp.float32)   # (B, T, C)
    B, T, C = x.shape
    for l in range(w_all.shape[0]):
        xp = jnp.pad(x, ((0, 0), (K - 1, 0), (0, 0))).astype(jnp.bfloat16)
        cols = jnp.concatenate([xp[:, k:k + T, :] for k in range(K)], axis=-1)
        hab = jnp.einsum("btk,kd->btd", cols, w_all[l],
                         preferred_element_type=jnp.float32) + b_all[l][None]
        x = hab[..., :C] * jax.nn.sigmoid(hab[..., C:])       # f32 between layers
    return jnp.transpose(x, (0, 2, 1))


if __name__ == "__main__":
    B, C, T = 2, 32, 16          # batch, embedding_dim, sequence length
    n_layers, kernel_size = 3, 3

    key = jax.random.PRNGKey(0)
    key_x, key_p = jax.random.split(key)
    x = jax.random.normal(key_x, (B, C, T), jnp.float32)   # PyTorch NCT layout

    model = LanguageModulePallas(embedding_dim=C, n_layers=n_layers,
                                 kernel_size=kernel_size, key=key_p)

    out = jax.block_until_ready(model(x))
    ref = _reference_forward(x, model.w_all, model.b_all, kernel_size)

    assert out.shape == (B, C, T)
    assert out.dtype == x.dtype
    # Tolerance covers one bf16 ulp through the inter-layer casts (both paths cast
    # activations to bf16; a boundary rounding flip is ~4e-3 relative).
    assert jnp.allclose(out, ref, atol=2e-2, rtol=2e-2), "mismatch vs reference"

    print("KERNEL_OK")
</pallas_src>

<mosaic_0001>
module attributes {stable_mosaic.version = 11 : i64} {
  func.func @_glu_stack_kernel(%arg0: i32, %arg1: memref<2x16x32xf32, #tpu.memory_space<vmem>>, %arg2: memref<3x96x64xbf16, #tpu.memory_space<vmem>>, %arg3: memref<3x1x64xf32, #tpu.memory_space<vmem>>, %arg4: memref<2x16x32xf32, #tpu.memory_space<vmem>>, %arg5: memref<2x64x32xbf16, #tpu.memory_space<vmem>>) attributes {dimension_semantics = [#tpu.dimension_semantics<parallel>], iteration_bounds = array<i64: 1>, scalar_prefetch = 0 : i64, scratch_operands = 1 : i64, tpu.core_type = #tpu.core_type<tc>, window_params = [{transform_indices = @transform_0, window_bounds = array<i64: 2, 16, 32>}, {pipeline_mode = #tpu.pipeline_mode<synchronous>, transform_indices = @transform_1, window_bounds = array<i64: 3, 96, 64>}, {pipeline_mode = #tpu.pipeline_mode<synchronous>, transform_indices = @transform_2, window_bounds = array<i64: 3, 1, 64>}, {transform_indices = @transform_3, window_bounds = array<i64: 2, 16, 32>}]} {
    %cst = arith.constant 0.000000e+00 : bf16
    %0 = vector.broadcast %cst : bf16 to vector<16x32xbf16>
    %c0 = arith.constant 0 : index
    %c0_0 = arith.constant 0 : index
    %c0_1 = arith.constant 0 : index
    %1 = vector.load %arg5[%c0, %c0_0, %c0_1] : memref<2x64x32xbf16, #tpu.memory_space<vmem>>, vector<1x16x32xbf16>
    %2 = vector.shape_cast %1 : vector<1x16x32xbf16> to vector<16x32xbf16>
    %3 = vector.shape_cast %0 : vector<16x32xbf16> to vector<1x16x32xbf16>
    tpu.vector_store %arg5[%c0, %c0_0, %c0_1], %3 {strides = array<i32>} : memref<2x64x32xbf16, #tpu.memory_space<vmem>>, vector<1x16x32xbf16>,
    %cst_2 = arith.constant 0.000000e+00 : bf16
    %4 = vector.broadcast %cst_2 : bf16 to vector<16x32xbf16>
    %c0_3 = arith.constant 0 : index
    %c32 = arith.constant 32 : index
    %c0_4 = arith.constant 0 : index
    %5 = vector.load %arg5[%c0_3, %c32, %c0_4] : memref<2x64x32xbf16, #tpu.memory_space<vmem>>, vector<1x16x32xbf16>
    %6 = vector.shape_cast %5 : vector<1x16x32xbf16> to vector<16x32xbf16>
    %7 = vector.shape_cast %4 : vector<16x32xbf16> to vector<1x16x32xbf16>
    tpu.vector_store %arg5[%c0_3, %c32, %c0_4], %7 {strides = array<i32>} : memref<2x64x32xbf16, #tpu.memory_space<vmem>>, vector<1x16x32xbf16>,
    %cst_5 = arith.constant 0.000000e+00 : bf16
    %8 = vector.broadcast %cst_5 : bf16 to vector<16x32xbf16>
    %c1 = arith.constant 1 : index
    %c0_6 = arith.constant 0 : index
    %c0_7 = arith.constant 0 : index
    %9 = vector.load %arg5[%c1, %c0_6, %c0_7] : memref<2x64x32xbf16, #tpu.memory_space<vmem>>, vector<1x16x32xbf16>
    %10 = vector.shape_cast %9 : vector<1x16x32xbf16> to vector<16x32xbf16>
    %11 = vector.shape_cast %8 : vector<16x32xbf16> to vector<1x16x32xbf16>
    tpu.vector_store %arg5[%c1, %c0_6, %c0_7], %11 {strides = array<i32>} : memref<2x64x32xbf16, #tpu.memory_space<vmem>>, vector<1x16x32xbf16>,
    %cst_8 = arith.constant 0.000000e+00 : bf16
    %12 = vector.broadcast %cst_8 : bf16 to vector<16x32xbf16>
    %c1_9 = arith.constant 1 : index
    %c32_10 = arith.constant 32 : index
    %c0_11 = arith.constant 0 : index
    %13 = vector.load %arg5[%c1_9, %c32_10, %c0_11] : memref<2x64x32xbf16, #tpu.memory_space<vmem>>, vector<1x16x32xbf16>
    %14 = vector.shape_cast %13 : vector<1x16x32xbf16> to vector<16x32xbf16>
    %15 = vector.shape_cast %12 : vector<16x32xbf16> to vector<1x16x32xbf16>
    tpu.vector_store %arg5[%c1_9, %c32_10, %c0_11], %15 {strides = array<i32>} : memref<2x64x32xbf16, #tpu.memory_space<vmem>>, vector<1x16x32xbf16>,
    %c0_12 = arith.constant 0 : index
    %c0_13 = arith.constant 0 : index
    %c0_14 = arith.constant 0 : index
    %16 = vector.load %arg1[%c0_12, %c0_13, %c0_14] : memref<2x16x32xf32, #tpu.memory_space<vmem>>, vector<1x16x32xf32>
    %17 = vector.shape_cast %16 : vector<1x16x32xf32> to vector<16x32xf32>
    %18 = arith.truncf %17 : vector<16x32xf32> to vector<16x32xbf16>
    %c0_15 = arith.constant 0 : index
    %c16 = arith.constant 16 : index
    %c0_16 = arith.constant 0 : index
    %19 = vector.load %arg5[%c0_15, %c16, %c0_16] : memref<2x64x32xbf16, #tpu.memory_space<vmem>>, vector<1x16x32xbf16>
    %20 = vector.shape_cast %19 : vector<1x16x32xbf16> to vector<16x32xbf16>
    %21 = vector.shape_cast %18 : vector<16x32xbf16> to vector<1x16x32xbf16>
    tpu.vector_store %arg5[%c0_15, %c16, %c0_16], %21 {strides = array<i32>} : memref<2x64x32xbf16, #tpu.memory_space<vmem>>, vector<1x16x32xbf16>,
    %c1_17 = arith.constant 1 : index
    %c0_18 = arith.constant 0 : index
    %c0_19 = arith.constant 0 : index
    %22 = vector.load %arg1[%c1_17, %c0_18, %c0_19] : memref<2x16x32xf32, #tpu.memory_space<vmem>>, vector<1x16x32xf32>
    %23 = vector.shape_cast %22 : vector<1x16x32xf32> to vector<16x32xf32>
    %24 = arith.truncf %23 : vector<16x32xf32> to vector<16x32xbf16>
    %c0_20 = arith.constant 0 : index
    %c48 = arith.constant 48 : index
    %c0_21 = arith.constant 0 : index
    %25 = vector.load %arg5[%c0_20, %c48, %c0_21] : memref<2x64x32xbf16, #tpu.memory_space<vmem>>, vector<1x16x32xbf16>
    %26 = vector.shape_cast %25 : vector<1x16x32xbf16> to vector<16x32xbf16>
    %27 = vector.shape_cast %24 : vector<16x32xbf16> to vector<1x16x32xbf16>
    tpu.vector_store %arg5[%c0_20, %c48, %c0_21], %27 {strides = array<i32>} : memref<2x64x32xbf16, #tpu.memory_space<vmem>>, vector<1x16x32xbf16>,
    %c0_22 = arith.constant 0 : index
    %c0_23 = arith.constant 0 : index
    %c0_24 = arith.constant 0 : index
    %28 = vector.load %arg5[%c0_22, %c0_23, %c0_24] : memref<2x64x32xbf16, #tpu.memory_space<vmem>>, vector<1x32x32xbf16>
    %29 = vector.shape_cast %28 : vector<1x32x32xbf16> to vector<32x32xbf16>
    %30 = vector.extract_strided_slice %29 {offsets = [14, 0], sizes = [16, 32], strides = [1, 1]} : vector<32x32xbf16> to vector<16x32xbf16>
    %31 = vector.extract_strided_slice %29 {offsets = [15, 0], sizes = [16, 32], strides = [1, 1]} : vector<32x32xbf16> to vector<16x32xbf16>
    %32 = vector.extract_strided_slice %29 {offsets = [16, 0], sizes = [16, 32], strides = [1, 1]} : vector<32x32xbf16> to vector<16x32xbf16>
    %33 = tpu.concatenate %30, %31, %32 in 1 : vector<16x32xbf16>, vector<16x32xbf16>, vector<16x32xbf16> -> vector<16x96xbf16>
    %c0_25 = arith.constant 0 : index
    %c32_26 = arith.constant 32 : index
    %c0_27 = arith.constant 0 : index
    %34 = vector.load %arg5[%c0_25, %c32_26, %c0_27] : memref<2x64x32xbf16, #tpu.memory_space<vmem>>, vector<1x32x32xbf16>
    %35 = vector.shape_cast %34 : vector<1x32x32xbf16> to vector<32x32xbf16>
    %36 = vector.extract_strided_slice %35 {offsets = [14, 0], sizes = [16, 32], strides = [1, 1]} : vector<32x32xbf16> to vector<16x32xbf16>
    %37 = vector.extract_strided_slice %35 {offsets = [15, 0], sizes = [16, 32], strides = [1, 1]} : vector<32x32xbf16> to vector<16x32xbf16>
    %38 = vector.extract_strided_slice %35 {offsets = [16, 0], sizes = [16, 32], strides = [1, 1]} : vector<32x32xbf16> to vector<16x32xbf16>
    %39 = tpu.concatenate %36, %37, %38 in 1 : vector<16x32xbf16>, vector<16x32xbf16>, vector<16x32xbf16> -> vector<16x96xbf16>
    %40 = tpu.concatenate %33, %39 in 0 : vector<16x96xbf16>, vector<16x96xbf16> -> vector<32x96xbf16>
    %c0_28 = arith.constant 0 : index
    %c0_29 = arith.constant 0 : index
    %c0_30 = arith.constant 0 : index
    %41 = vector.load %arg2[%c0_28, %c0_29, %c0_30] : memref<3x96x64xbf16, #tpu.memory_space<vmem>>, vector<1x96x64xbf16>
    %42 = vector.shape_cast %41 : vector<1x96x64xbf16> to vector<96x64xbf16>
    %cst_31 = arith.constant dense<0.000000e+00> : vector<32x64xf32>
    %43 = tpu.matmul %40, %42, %cst_31 {dimension_numbers = #tpu.dot_dimension_numbers<[1], [0], [0], [1], [0, 0, 1, 1], [], []>} : vector<32x96xbf16>, vector<96x64xbf16>, vector<32x64xf32> -> vector<32x64xf32>
    %c0_32 = arith.constant 0 : index
    %c0_33 = arith.constant 0 : index
    %c0_34 = arith.constant 0 : index
    %44 = vector.load %arg3[%c0_32, %c0_33, %c0_34] : memref<3x1x64xf32, #tpu.memory_space<vmem>>, vector<1x1x64xf32>
    %45 = vector.shape_cast %44 : vector<1x1x64xf32> to vector<1x64xf32>
    %46 = vector.broadcast %45 : vector<1x64xf32> to vector<32x64xf32>
    %47 = arith.addf %43, %46 : vector<32x64xf32>
    %48 = vector.extract_strided_slice %47 {offsets = [0, 0], sizes = [32, 32], strides = [1, 1]} : vector<32x64xf32> to vector<32x32xf32>
    %49 = vector.extract_strided_slice %47 {offsets = [0, 32], sizes = [32, 32], strides = [1, 1]} : vector<32x64xf32> to vector<32x32xf32>
    %50 = arith.negf %49 : vector<32x32xf32>
    %51 = math.exp %50 : vector<32x32xf32>
    %cst_35 = arith.constant 1.000000e+00 : f32
    %52 = vector.broadcast %cst_35 : f32 to vector<32x32xf32>
    %53 = arith.addf %52, %51 : vector<32x32xf32>
    %54 = arith.divf %52, %53 : vector<32x32xf32>
    %55 = arith.mulf %48, %54 : vector<32x32xf32>
    %56 = vector.extract_strided_slice %55 {offsets = [0, 0], sizes = [16, 32], strides = [1, 1]} : vector<32x32xf32> to vector<16x32xf32>
    %57 = arith.truncf %56 : vector<16x32xf32> to vector<16x32xbf16>
    %c1_36 = arith.constant 1 : index
    %c16_37 = arith.constant 16 : index
    %c0_38 = arith.constant 0 : index
    %58 = vector.load %arg5[%c1_36, %c16_37, %c0_38] : memref<2x64x32xbf16, #tpu.memory_space<vmem>>, vector<1x16x32xbf16>
    %59 = vector.shape_cast %58 : vector<1x16x32xbf16> to vector<16x32xbf16>
    %60 = vector.shape_cast %57 : vector<16x32xbf16> to vector<1x16x32xbf16>
    tpu.vector_store %arg5[%c1_36, %c16_37, %c0_38], %60 {strides = array<i32>} : memref<2x64x32xbf16, #tpu.memory_space<vmem>>, vector<1x16x32xbf16>,
    %61 = vector.extract_strided_slice %55 {offsets = [16, 0], sizes = [16, 32], strides = [1, 1]} : vector<32x32xf32> to vector<16x32xf32>
    %62 = arith.truncf %61 : vector<16x32xf32> to vector<16x32xbf16>
    %c1_39 = arith.constant 1 : index
    %c48_40 = arith.constant 48 : index
    %c0_41 = arith.constant 0 : index
    %63 = vector.load %arg5[%c1_39, %c48_40, %c0_41] : memref<2x64x32xbf16, #tpu.memory_space<vmem>>, vector<1x16x32xbf16>
    %64 = vector.shape_cast %63 : vector<1x16x32xbf16> to vector<16x32xbf16>
    %65 = vector.shape_cast %62 : vector<16x32xbf16> to vector<1x16x32xbf16>
    tpu.vector_store %arg5[%c1_39, %c48_40, %c0_41], %65 {strides = array<i32>} : memref<2x64x32xbf16, #tpu.memory_space<vmem>>, vector<1x16x32xbf16>,
    %c1_42 = arith.constant 1 : index
    %c0_43 = arith.constant 0 : index
    %c0_44 = arith.constant 0 : index
    %66 = vector.load %arg5[%c1_42, %c0_43, %c0_44] : memref<2x64x32xbf16, #tpu.memory_space<vmem>>, vector<1x32x32xbf16>
    %67 = vector.shape_cast %66 : vector<1x32x32xbf16> to vector<32x32xbf16>
    %68 = vector.extract_strided_slice %67 {offsets = [14, 0], sizes = [16, 32], strides = [1, 1]} : vector<32x32xbf16> to vector<16x32xbf16>
    %69 = vector.extract_strided_slice %67 {offsets = [15, 0], sizes = [16, 32], strides = [1, 1]} : vector<32x32xbf16> to vector<16x32xbf16>
    %70 = vector.extract_strided_slice %67 {offsets = [16, 0], sizes = [16, 32], strides = [1, 1]} : vector<32x32xbf16> to vector<16x32xbf16>
    %71 = tpu.concatenate %68, %69, %70 in 1 : vector<16x32xbf16>, vector<16x32xbf16>, vector<16x32xbf16> -> vector<16x96xbf16>
    %c1_45 = arith.constant 1 : index
    %c32_46 = arith.constant 32 : index
    %c0_47 = arith.constant 0 : index
    %72 = vector.load %arg5[%c1_45, %c32_46, %c0_47] : memref<2x64x32xbf16, #tpu.memory_space<vmem>>, vector<1x32x32xbf16>
    %73 = vector.shape_cast %72 : vector<1x32x32xbf16> to vector<32x32xbf16>
    %74 = vector.extract_strided_slice %73 {offsets = [14, 0], sizes = [16, 32], strides = [1, 1]} : vector<32x32xbf16> to vector<16x32xbf16>
    %75 = vector.extract_strided_slice %73 {offsets = [15, 0], sizes = [16, 32], strides = [1, 1]} : vector<32x32xbf16> to vector<16x32xbf16>
    %76 = vector.extract_strided_slice %73 {offsets = [16, 0], sizes = [16, 32], strides = [1, 1]} : vector<32x32xbf16> to vector<16x32xbf16>
    %77 = tpu.concatenate %74, %75, %76 in 1 : vector<16x32xbf16>, vector<16x32xbf16>, vector<16x32xbf16> -> vector<16x96xbf16>
    %78 = tpu.concatenate %71, %77 in 0 : vector<16x96xbf16>, vector<16x96xbf16> -> vector<32x96xbf16>
    %c1_48 = arith.constant 1 : index
    %c0_49 = arith.constant 0 : index
    %c0_50 = arith.constant 0 : index
    %79 = vector.load %arg2[%c1_48, %c0_49, %c0_50] : memref<3x96x64xbf16, #tpu.memory_space<vmem>>, vector<1x96x64xbf16>
    %80 = vector.shape_cast %79 : vector<1x96x64xbf16> to vector<96x64xbf16>
    %cst_51 = arith.constant dense<0.000000e+00> : vector<32x64xf32>
    %81 = tpu.matmul %78, %80, %cst_51 {dimension_numbers = #tpu.dot_dimension_numbers<[1], [0], [0], [1], [0, 0, 1, 1], [], []>} : vector<32x96xbf16>, vector<96x64xbf16>, vector<32x64xf32> -> vector<32x64xf32>
    %c1_52 = arith.constant 1 : index
    %c0_53 = arith.constant 0 : index
    %c0_54 = arith.constant 0 : index
    %82 = vector.load %arg3[%c1_52, %c0_53, %c0_54] : memref<3x1x64xf32, #tpu.memory_space<vmem>>, vector<1x1x64xf32>
    %83 = vector.shape_cast %82 : vector<1x1x64xf32> to vector<1x64xf32>
    %84 = vector.broadcast %83 : vector<1x64xf32> to vector<32x64xf32>
    %85 = arith.addf %81, %84 : vector<32x64xf32>
    %86 = vector.extract_strided_slice %85 {offsets = [0, 0], sizes = [32, 32], strides = [1, 1]} : vector<32x64xf32> to vector<32x32xf32>
    %87 = vector.extract_strided_slice %85 {offsets = [0, 32], sizes = [32, 32], strides = [1, 1]} : vector<32x64xf32> to vector<32x32xf32>
    %88 = arith.negf %87 : vector<32x32xf32>
    %89 = math.exp %88 : vector<32x32xf32>
    %cst_55 = arith.constant 1.000000e+00 : f32
    %90 = vector.broadcast %cst_55 : f32 to vector<32x32xf32>
    %91 = arith.addf %90, %89 : vector<32x32xf32>
    %92 = arith.divf %90, %91 : vector<32x32xf32>
    %93 = arith.mulf %86, %92 : vector<32x32xf32>
    %94 = vector.extract_strided_slice %93 {offsets = [0, 0], sizes = [16, 32], strides = [1, 1]} : vector<32x32xf32> to vector<16x32xf32>
    %95 = arith.truncf %94 : vector<16x32xf32> to vector<16x32xbf16>
    %c0_56 = arith.constant 0 : index
    %c16_57 = arith.constant 16 : index
    %c0_58 = arith.constant 0 : index
    %96 = vector.load %arg5[%c0_56, %c16_57, %c0_58] : memref<2x64x32xbf16, #tpu.memory_space<vmem>>, vector<1x16x32xbf16>
    %97 = vector.shape_cast %96 : vector<1x16x32xbf16> to vector<16x32xbf16>
    %98 = vector.shape_cast %95 : vector<16x32xbf16> to vector<1x16x32xbf16>
    tpu.vector_store %arg5[%c0_56, %c16_57, %c0_58], %98 {strides = array<i32>} : memref<2x64x32xbf16, #tpu.memory_space<vmem>>, vector<1x16x32xbf16>,
    %99 = vector.extract_strided_slice %93 {offsets = [16, 0], sizes = [16, 32], strides = [1, 1]} : vector<32x32xf32> to vector<16x32xf32>
    %100 = arith.truncf %99 : vector<16x32xf32> to vector<16x32xbf16>
    %c0_59 = arith.constant 0 : index
    %c48_60 = arith.constant 48 : index
    %c0_61 = arith.constant 0 : index
    %101 = vector.load %arg5[%c0_59, %c48_60, %c0_61] : memref<2x64x32xbf16, #tpu.memory_space<vmem>>, vector<1x16x32xbf16>
    %102 = vector.shape_cast %101 : vector<1x16x32xbf16> to vector<16x32xbf16>
    %103 = vector.shape_cast %100 : vector<16x32xbf16> to vector<1x16x32xbf16>
    tpu.vector_store %arg5[%c0_59, %c48_60, %c0_61], %103 {strides = array<i32>} : memref<2x64x32xbf16, #tpu.memory_space<vmem>>, vector<1x16x32xbf16>,
    %c0_62 = arith.constant 0 : index
    %c0_63 = arith.constant 0 : index
    %c0_64 = arith.constant 0 : index
    %104 = vector.load %arg5[%c0_62, %c0_63, %c0_64] : memref<2x64x32xbf16, #tpu.memory_space<vmem>>, vector<1x32x32xbf16>
    %105 = vector.shape_cast %104 : vector<1x32x32xbf16> to vector<32x32xbf16>
    %106 = vector.extract_strided_slice %105 {offsets = [14, 0], sizes = [16, 32], strides = [1, 1]} : vector<32x32xbf16> to vector<16x32xbf16>
    %107 = vector.extract_strided_slice %105 {offsets = [15, 0], sizes = [16, 32], strides = [1, 1]} : vector<32x32xbf16> to vector<16x32xbf16>
    %108 = vector.extract_strided_slice %105 {offsets = [16, 0], sizes = [16, 32], strides = [1, 1]} : vector<32x32xbf16> to vector<16x32xbf16>
    %109 = tpu.concatenate %106, %107, %108 in 1 : vector<16x32xbf16>, vector<16x32xbf16>, vector<16x32xbf16> -> vector<16x96xbf16>
    %c0_65 = arith.constant 0 : index
    %c32_66 = arith.constant 32 : index
    %c0_67 = arith.constant 0 : index
    %110 = vector.load %arg5[%c0_65, %c32_66, %c0_67] : memref<2x64x32xbf16, #tpu.memory_space<vmem>>, vector<1x32x32xbf16>
    %111 = vector.shape_cast %110 : vector<1x32x32xbf16> to vector<32x32xbf16>
    %112 = vector.extract_strided_slice %111 {offsets = [14, 0], sizes = [16, 32], strides = [1, 1]} : vector<32x32xbf16> to vector<16x32xbf16>
    %113 = vector.extract_strided_slice %111 {offsets = [15, 0], sizes = [16, 32], strides = [1, 1]} : vector<32x32xbf16> to vector<16x32xbf16>
    %114 = vector.extract_strided_slice %111 {offsets = [16, 0], sizes = [16, 32], strides = [1, 1]} : vector<32x32xbf16> to vector<16x32xbf16>
    %115 = tpu.concatenate %112, %113, %114 in 1 : vector<16x32xbf16>, vector<16x32xbf16>, vector<16x32xbf16> -> vector<16x96xbf16>
    %116 = tpu.concatenate %109, %115 in 0 : vector<16x96xbf16>, vector<16x96xbf16> -> vector<32x96xbf16>
    %c2 = arith.constant 2 : index
    %c0_68 = arith.constant 0 : index
    %c0_69 = arith.constant 0 : index
    %117 = vector.load %arg2[%c2, %c0_68, %c0_69] : memref<3x96x64xbf16, #tpu.memory_space<vmem>>, vector<1x96x64xbf16>
    %118 = vector.shape_cast %117 : vector<1x96x64xbf16> to vector<96x64xbf16>
    %cst_70 = arith.constant dense<0.000000e+00> : vector<32x64xf32>
    %119 = tpu.matmul %116, %118, %cst_70 {dimension_numbers = #tpu.dot_dimension_numbers<[1], [0], [0], [1], [0, 0, 1, 1], [], []>} : vector<32x96xbf16>, vector<96x64xbf16>, vector<32x64xf32> -> vector<32x64xf32>
    %c2_71 = arith.constant 2 : index
    %c0_72 = arith.constant 0 : index
    %c0_73 = arith.constant 0 : index
    %120 = vector.load %arg3[%c2_71, %c0_72, %c0_73] : memref<3x1x64xf32, #tpu.memory_space<vmem>>, vector<1x1x64xf32>
    %121 = vector.shape_cast %120 : vector<1x1x64xf32> to vector<1x64xf32>
    %122 = vector.broadcast %121 : vector<1x64xf32> to vector<32x64xf32>
    %123 = arith.addf %119, %122 : vector<32x64xf32>
    %124 = vector.extract_strided_slice %123 {offsets = [0, 0], sizes = [32, 32], strides = [1, 1]} : vector<32x64xf32> to vector<32x32xf32>
    %125 = vector.extract_strided_slice %123 {offsets = [0, 32], sizes = [32, 32], strides = [1, 1]} : vector<32x64xf32> to vector<32x32xf32>
    %126 = arith.negf %125 : vector<32x32xf32>
    %127 = math.exp %126 : vector<32x32xf32>
    %cst_74 = arith.constant 1.000000e+00 : f32
    %128 = vector.broadcast %cst_74 : f32 to vector<32x32xf32>
    %129 = arith.addf %128, %127 : vector<32x32xf32>
    %130 = arith.divf %128, %129 : vector<32x32xf32>
    %131 = arith.mulf %124, %130 : vector<32x32xf32>
    %132 = vector.extract_strided_slice %131 {offsets = [0, 0], sizes = [16, 32], strides = [1, 1]} : vector<32x32xf32> to vector<16x32xf32>
    %c0_75 = arith.constant 0 : index
    %c0_76 = arith.constant 0 : index
    %c0_77 = arith.constant 0 : index
    %133 = vector.load %arg4[%c0_75, %c0_76, %c0_77] : memref<2x16x32xf32, #tpu.memory_space<vmem>>, vector<1x16x32xf32>
    %134 = vector.shape_cast %133 : vector<1x16x32xf32> to vector<16x32xf32>
    %135 = vector.shape_cast %132 : vector<16x32xf32> to vector<1x16x32xf32>
    tpu.vector_store %arg4[%c0_75, %c0_76, %c0_77], %135 {strides = array<i32>} : memref<2x16x32xf32, #tpu.memory_space<vmem>>, vector<1x16x32xf32>,
    %136 = vector.extract_strided_slice %131 {offsets = [16, 0], sizes = [16, 32], strides = [1, 1]} : vector<32x32xf32> to vector<16x32xf32>
    %c1_78 = arith.constant 1 : index
    %c0_79 = arith.constant 0 : index
    %c0_80 = arith.constant 0 : index
    %137 = vector.load %arg4[%c1_78, %c0_79, %c0_80] : memref<2x16x32xf32, #tpu.memory_space<vmem>>, vector<1x16x32xf32>
    %138 = vector.shape_cast %137 : vector<1x16x32xf32> to vector<16x32xf32>
    %139 = vector.shape_cast %136 : vector<16x32xf32> to vector<1x16x32xf32>
    tpu.vector_store %arg4[%c1_78, %c0_79, %c0_80], %139 {strides = array<i32>} : memref<2x16x32xf32, #tpu.memory_space<vmem>>, vector<1x16x32xf32>,
    return
  }
  func.func @transform_0(%arg0: i32) -> (i32, i32, i32) {
    %c0_i32 = arith.constant 0 : i32
    %c0_i32_0 = arith.constant 0 : i32
    %c0_i32_1 = arith.constant 0 : i32
    return %arg0, %c0_i32, %c0_i32_0 : i32, i32, i32
  }
  func.func @transform_1(%arg0: i32) -> (i32, i32, i32) {
    %c0_i32 = arith.constant 0 : i32
    %c0_i32_0 = arith.constant 0 : i32
    %c0_i32_1 = arith.constant 0 : i32
    %c0_i32_2 = arith.constant 0 : i32
    return %c0_i32, %c0_i32_0, %c0_i32_1 : i32, i32, i32
  }
  func.func @transform_2(%arg0: i32) -> (i32, i32, i32) {
    %c0_i32 = arith.constant 0 : i32
    %c0_i32_0 = arith.constant 0 : i32
    %c0_i32_1 = arith.constant 0 : i32
    %c0_i32_2 = arith.constant 0 : i32
    return %c0_i32, %c0_i32_0, %c0_i32_1 : i32, i32, i32
  }
  func.func @transform_3(%arg0: i32) -> (i32, i32, i32) {
    %c0_i32 = arith.constant 0 : i32
    %c0_i32_0 = arith.constant 0 : i32
    %c0_i32_1 = arith.constant 0 : i32
    return %arg0, %c0_i32, %c0_i32_0 : i32, i32, i32
  }
}

</mosaic_0001>

<bundles_post_ra>
// kernel: language_module_forward.1
= control target key start
LH: loop header
LB: loop body
LE: loop exit
PB: predicated region body
PF: predicated region fallthrough
CT: control target
= control target key end

     0   :  { %vm16_vm0 = vcmask 261120   ;;  %v964_v3 = vmov 0   ;;  %vm33_vm1 = vsmask.f32 7424  ;;  %s965_s29 = smov 64   ;;  %s966_s30 = smov 32   ;;  %s1182_s0 = inlined_call_operand.vmem [shape: f32[2,16,32], index: 0, kind: input, shape index: {}]   ;;  %s1183_s1 = inlined_call_operand.vmem [shape: bf16[3,96,64], index: 1, kind: input, shape index: {}]   ;;  %s1184_s2 = inlined_call_operand.vmem [shape: f32[3,1,64], index: 2, kind: input, shape index: {}]   ;;  %s1185_s3 = inlined_call_operand.hbm [shape: f32[2,16,32], index: 3, kind: output, shape index: {}]  }
   0x1   :  { %v22_v0 = vld [vmem:[%s1182_s0] sm:$0xff]  ;;  %v23_v1 = vld [vmem:[%s1182_s0 + $0x8] sm:$0xff]  ;;  %17 = vst.msk [vmem:[#allocation2] sm:$0xff] %vm16_vm0, %v964_v3  ;;  %18 = vst.msk [vmem:[#allocation2 + $0x10] sm:$0xff] %vm16_vm0, %v964_v3 }
   0x2   :  { %v24_v2 = vpack.c.bf16 %v23_v1, %v22_v0  ;;  %20 = vst.msk [vmem:[#allocation2 + $0x20] sm:$0xff] %vm16_vm0, %v964_v3  ;;  %21 = vst.msk [vmem:[#allocation2 + $0x30] sm:$0xff] %vm16_vm0, %v964_v3  ;;  %v728_v4 = vld [vmem:[%s1182_s0 + $0x10] sm:$0xff]  ;;  %v729_v5 = vld [vmem:[%s1182_s0 + $0x18] sm:$0xff] }
   0x3   :  { %v29_v6 = vpack.c.bf16 %v729_v5, %v728_v4  ;;  %v874_v7 = vld [vmem:[%s1183_s1] sm:$0xff]   ;;  %v875_v8 = vld [vmem:[%s1183_s1 + $0x8] sm:$0xff]   ;;  %v876_v9 = vld [vmem:[%s1183_s1 + $0x10] sm:$0xff]  }
   0x4   :  { %25 = vst.msk [vmem:[#allocation2 + $0x8] sm:$0xff] %vm16_vm0, %v24_v2  ;;  %819 = vmatprep.subr.bf16.mxu0 %v874_v7  ;;  %v877_v13 = vld [vmem:[%s1183_s1 + $0x18] sm:$0xff]   ;;  %v878_v21 = vld [vmem:[%s1183_s1 + $0x20] sm:$0xff]   ;;  %v879_v29 = vld [vmem:[%s1183_s1 + $0x28] sm:$0xff]  }
   0x5   :  { %30 = vst.msk [vmem:[#allocation2 + $0x18] sm:$0xff] %vm16_vm0, %v29_v6  ;;  %820 = vmatpush3.bf16.msra.mxu0 %v874_v7 }
   0x6   :  { %821 = vmatprep.subr.bf16.mxu0 %v875_v8 }
   0x8   :  { %v1018_v10 = vld [vmem:[#allocation2] sm:$0xff]  ;;  %v1020_v11 = vld [vmem:[#allocation2 + $0x10] sm:$0xff] }
   0x9   :  { %822 = vmatpush3.bf16.msra.mxu0 %v875_v8  ;;  %v35_v15 = vshrl.u32 %v1018_v10, 16  ;;  %v64_v18 = vshrl.u32 %v1020_v11, 16 }
   0xa   :  { %823 = vmatprep.subr.bf16.mxu0 %v876_v9 }
   0xb   :  { %v32_v12 = vld [vmem:[#allocation2 + $0x8] sm:$0xff] }
   0xc   :  { %v50_v14 = vrot.slane %v32_v12, 1  ;;  %v38_v16 = vshll.u32 %v32_v12, 16  ;;  %v62_v17 = vld [vmem:[#allocation2 + $0x18] sm:$0xff]  ;;  %v42_v20 = vshrl.u32 %v32_v12, 16 }
   0xd   :  { %v67_v19 = vshll.u32 %v62_v17, 16  ;;  %v79_v23 = vrot.slane %v62_v17, 1  ;;  %824 = vmatpush3.bf16.msra.mxu0 %v876_v9  ;;  %v71_v25 = vshrl.u32 %v62_v17, 16 }
   0xe   :  { %51 = vrot.lane.b32.xlu1 %v50_v14, %s965_s29  ;;  %v40_v22 = vrot.slane %v38_v16, 1  ;;  %825 = vmatprep.subr.bf16.mxu0 %v877_v13 }
   0xf   :  { %v69_v24 = vrot.slane %v67_v19, 1 }
  0x10   :  { %v41_v26 = vsel %vm33_vm1, %v35_v15, %v40_v22  ;;  %v44_v28 = vor.u32 %v42_v20, %v40_v22 }
  0x11   :  { %45 = vrot.lane.b32.xlu0 %v41_v26, %s966_s30  ;;  %v70_v27 = vsel %vm33_vm1, %v64_v18, %v69_v24  ;;  %826 = vmatpush3.bf16.msra.mxu0 %v877_v13 }
  0x12   :  { %74 = vrot.lane.b32.xlu1 %v70_v27, %s966_s30  ;;  %827 = vmatprep.subr.bf16.mxu0 %v878_v21 }
  0x13   :  { %8 = vsyncpa [#allocation4], 0  ;;  %v73_v30 = vor.u32 %v71_v25, %v69_v24  ;;  %vm57_vm2 = vcmask 523264   ;;  %vm91_vm3 = vcmask 1040384   ;;  %vm155_vm4 = vcmask 785408   ;;  %s967_s8 = smov 96  }
  0x14   :  { %v730_v51 = vld [vmem:[%s1184_s2] ss:$0 sm:$0xff]  ;;  %v880_v14 = vld [vmem:[%s1183_s1 + $0x30] sm:$0xff]   ;;  %v881_v16 = vld [vmem:[%s1183_s1 + $0x38] sm:$0xff]  }
  0x15   :  { %47 = vrot.lane.b32.xlu0 %v44_v28, %s966_s30  ;;  %828 = vmatpush3.bf16.msra.mxu0 %v878_v21  ;;  %v882_v22 = vld [vmem:[%s1183_s1 + $0x40] sm:$0xff]  }
  0x16   :  { %80 = vrot.lane.b32.xlu1 %v79_v23, %s965_s29  ;;  %829 = vmatprep.subr.bf16.mxu0 %v879_v29 }
  0x17   :  { %835 = vmatprep.subr.bf16.mxu1 %v880_v14 }
  0x18   :  { %836 = vmatpush3.bf16.msra.mxu1 %v880_v14 }
  0x19   :  { %76 = vrot.lane.b32.xlu0 %v73_v30, %s966_s30  ;;  %830 = vmatpush3.bf16.msra.mxu0 %v879_v29  ;;  %v883_v29 = vld [vmem:[%s1183_s1 + $0x48] sm:$0xff]   ;;  %v259_v30 = vld [vmem:[#allocation2 + $0x20] sm:$0xff] }
  0x1a   :  { %837 = vmatprep.subr.bf16.mxu1 %v881_v16 }
  0x1c   :  { %838 = vmatpush3.bf16.msra.mxu1 %v881_v16 }
  0x1d   :  { %839 = vmatprep.subr.bf16.mxu1 %v882_v22 }
  0x20   :  { %840 = vmatpush3.bf16.msra.mxu1 %v882_v22 }
  0x21   :  { %841 = vmatprep.subr.bf16.mxu1 %v883_v29 }
  0x24   :  { %842 = vmatpush3.bf16.msra.mxu1 %v883_v29 }
  0x80   :  { %v52_v31 = vpop.permute.xlu1 %51 }
  0x83   :  { %v46_v32 = vpop.permute.xlu0 %45 }
  0x84   :  { %v54_v33 = vsel %vm16_vm0, %v1018_v10, %v46_v32  ;;  %v75_v34 = vpop.permute.xlu1 %74  ;;  %v884_v32 = vld [vmem:[%s1183_s1 + $0x50] sm:$0xff]  }
  0x85   :  { %v59_v35 = vsel %vm57_vm2, %v54_v33, %v52_v31  ;;  %v83_v37 = vsel %vm16_vm0, %v1020_v11, %v75_v34  ;;  %v262_v34 = vshrl.u32 %v259_v30, 16  ;;  %843 = vmatprep.subr.bf16.mxu1 %v884_v32 }
  0x86   :  { %v92_v41 = vrot.slane %v59_v35, 7  ;;  %844 = vmatpush3.bf16.msra.mxu1 %v884_v32 }
  0x87   :  { %v48_v36 = vpop.permute.xlu0 %47 }
  0x88   :  { %v56_v38 = vsel %vm16_vm0, %v32_v12, %v48_v36  ;;  %v81_v39 = vpop.permute.xlu1 %80  ;;  %v287_v36 = vld [vmem:[#allocation2 + $0x30] sm:$0xff] }
  0x89   :  { %v60_v40 = vsel %vm57_vm2, %v56_v38, %v52_v31  ;;  %v87_v43 = vsel %vm57_vm2, %v83_v37, %v81_v39 }
  0x8a   :  { %v93_v42 = vrot.slane %v60_v40, 7  ;;  %v97_v48 = vrot.slane %v87_v43, 7 }
  0x8b   :  { %v77_v44 = vpop.permute.xlu0 %76 }
  0x8c   :  { %v85_v45 = vsel %vm16_vm0, %v62_v17, %v77_v44  ;;  %v94_v46 = vsel %vm91_vm3, %v92_v41, %v93_v42  ;;  %v290_v41 = vshrl.u32 %v287_v36, 16 }
  0x8d   :  { %v88_v47 = vsel %vm57_vm2, %v85_v45, %v81_v39  ;;  %831 = vmatprep.mubr.msk.bf16.mxu0 %vm155_vm4, %v94_v46  ;;  %v885_v39 = vld [vmem:[%s1183_s1 + $0x58] sm:$0xff]  }
  0x8e   :  { %v98_v49 = vrot.slane %v88_v47, 7  ;;  %845 = vmatprep.subr.bf16.mxu1 %v885_v39 }
  0x8f   :  { %846 = vmatpush3.bf16.msra.mxu1 %v885_v39 }
  0x90   :  { %v99_v50 = vsel %vm91_vm3, %v97_v48, %v98_v49 }
  0x91   :  { %832 = vmatmul.mubr.msk.bf16.vlgmr.msra.gmra.mrb[0].mxu0 %vm155_vm4, %v99_v50 }
 0x164   :  { %v833_v52 = vpop.f32.mrb[0].mxu0 }
 0x165   :  { %v205_v53 = vadd.f32 %v833_v52, %v730_v51  ;;  %v196_v54 = vpop.f32.mrb[1].mxu0 }
 0x166   :  { %v197_v55 = vadd.f32 %v730_v51, %v196_v54  ;;  %v834_v56 = vpop.f32.mrb[2].mxu0 }
 0x167   :  { %v741_v57 = vmul.f32 -1.442695, %v205_v53  ;;  %v208_v58 = vadd.f32 %v834_v56, %v730_v51  ;;  %v199_v59 = vpop.f32.mrb[3].mxu0 }
 0x168   :  { %v739_v60 = vmul.f32 -1.442695, %v197_v55  ;;  %v200_v61 = vadd.f32 %v730_v51, %v199_v59 }
 0x169   :  { %892 = vpow2.f32 %v741_v57  ;;  %v742_v62 = vmul.f32 -1.442695, %v208_v58 }
 0x16a   :  { %894 = vpow2.f32 %v739_v60  ;;  %v740_v63 = vmul.f32 -1.442695, %v200_v61 }
 0x16b   :  { %896 = vpow2.f32 %v742_v62 }
 0x16c   :  { %898 = vpow2.f32 %v740_v63 }
 0x173   :  { %v893_v0 = vpop.eup %892 }
 0x174   :  { %v895_v1 = vpop.eup %894  ;;  %v225_v5 = vadd.f32 1.0, %v893_v0 }
 0x175   :  { %v897_v2 = vpop.eup %896  ;;  %v223_v3 = vadd.f32 1.0, %v895_v1 }
 0x176   :  { %v899_v4 = vpop.eup %898  ;;  %v226_v7 = vadd.f32 1.0, %v897_v2 }
 0x177   :  { %900 = vrcp.f32 %v223_v3  ;;  %v224_v6 = vadd.f32 1.0, %v899_v4 }
 0x179   :  { %902 = vrcp.f32 %v224_v6  ;;  %v756_v6 = vld [vmem:[%s1184_s2 + $0x1] ss:$0 sm:$0xff] }
 0x17a   :  { %904 = vrcp.f32 %v225_v5 }
 0x17b   :  { %906 = vrcp.f32 %v226_v7 }
 0x181   :  { %v901_v8 = vpop.eup %900 }
 0x182   :  { %239 = vrot.lane.b32.xlu0 %v901_v8, %s967_s8 }
 0x183   :  { %v903_v9 = vpop.eup %902 }
 0x184   :  { %241 = vrot.lane.b32.xlu1 %v903_v9, %s967_s8  ;;  %v905_v12 = vpop.eup %904 }
 0x185   :  { %v907_v13 = vpop.eup %906 }
 0x186   :  { %243 = vrot.lane.b32.xlu0 %v905_v12, %s967_s8 }
 0x188   :  { %245 = vrot.lane.b32.xlu1 %v907_v13, %s967_s8 }
 0x1f4   :  { %v240_v17 = vpop.permute.xlu0 %239 }
 0x1f5   :  { %v251_v20 = vmul.f32 %v240_v17, %v197_v55 }
 0x1f6   :  { %v242_v19 = vpop.permute.xlu1 %241 }
 0x1f7   :  { %v252_v21 = vmul.f32 %v242_v19, %v200_v61 }
 0x1f8   :  { %v244_v23 = vpop.permute.xlu0 %243 }
 0x1f9   :  { %v255_v24 = vpack.c.bf16 %v252_v21, %v251_v20  ;;  %v253_v26 = vmul.f32 %v244_v23, %v205_v53 }
 0x1fa   :  { %v246_v25 = vpop.permute.xlu1 %245 }
 0x1fb   :  { %256 = vst.msk [vmem:[#allocation2 + $0x28] sm:$0xff] %vm16_vm0, %v255_v24  ;;  %v254_v27 = vmul.f32 %v246_v25, %v208_v58 }
 0x1fd   :  { %v257_v28 = vpack.c.bf16 %v254_v27, %v253_v26 }
 0x1ff   :  { %258 = vst.msk [vmem:[#allocation2 + $0x38] sm:$0xff] %vm16_vm0, %v257_v28 }
 0x202   :  { %v260_v31 = vld [vmem:[#allocation2 + $0x28] sm:$0xff] }
 0x203   :  { %v277_v33 = vrot.slane %v260_v31, 1  ;;  %v265_v35 = vshll.u32 %v260_v31, 16  ;;  %v269_v47 = vshrl.u32 %v260_v31, 16 }
 0x205   :  { %278 = vrot.lane.b32.xlu0 %v277_v33, %s965_s29  ;;  %v267_v37 = vrot.slane %v265_v35, 1  ;;  %v886_v35 = vld [vmem:[%s1183_s1 + $0x60] sm:$0xff]  }
 0x206   :  { %v288_v38 = vld [vmem:[#allocation2 + $0x38] sm:$0xff]  ;;  %851 = vmatprep.subr.bf16.mxu0 %v886_v35 }
 0x207   :  { %v268_v40 = vsel %vm33_vm1, %v262_v34, %v267_v37  ;;  %v293_v42 = vshll.u32 %v288_v38, 16  ;;  %v297_v44 = vshrl.u32 %v288_v38, 16  ;;  %v271_v48 = vor.u32 %v269_v47, %v267_v37  ;;  %852 = vmatpush3.bf16.msra.mxu0 %v886_v35 }
 0x208   :  { %v305_v49 = vrot.slane %v288_v38, 1 }
 0x209   :  { %272 = vrot.lane.b32.xlu0 %v268_v40, %s966_s30  ;;  %v295_v43 = vrot.slane %v293_v42, 1 }
 0x20b   :  { %v296_v45 = vsel %vm33_vm1, %v290_v41, %v295_v43  ;;  %v299_v46 = vor.u32 %v297_v44, %v295_v43  ;;  %v888_v41 = vld [vmem:[%s1183_s1 + $0x70] sm:$0xff]  }
 0x20c   :  { %300 = vrot.lane.b32.xlu1 %v296_v45, %s966_s30 }
 0x20d   :  { %302 = vrot.lane.b32.xlu0 %v299_v46, %s966_s30 }
 0x210   :  { %274 = vrot.lane.b32.xlu1 %v271_v48, %s966_s30  ;;  %v889_v48 = vld [vmem:[%s1183_s1 + $0x78] sm:$0xff]  }
 0x214   :  { %306 = vrot.lane.b32.xlu1 %v305_v49, %s965_s29 }
 0x277   :  { %v279_v50 = vpop.permute.xlu0 %278 }
 0x27b   :  { %v273_v51 = vpop.permute.xlu0 %272 }
 0x27c   :  { %v281_v53 = vsel %vm16_vm0, %v259_v30, %v273_v51 }
 0x27d   :  { %v285_v54 = vsel %vm57_vm2, %v281_v53, %v279_v50 }
 0x27e   :  { %v301_v52 = vpop.permute.xlu1 %300  ;;  %v317_v59 = vrot.slane %v285_v54, 7 }
 0x27f   :  { %v303_v56 = vpop.permute.xlu0 %302  ;;  %v309_v61 = vsel %vm16_vm0, %v287_v36, %v301_v52  ;;  %v887_v36 = vld [vmem:[%s1183_s1 + $0x68] sm:$0xff]  }
 0x280   :  { %v311_v62 = vsel %vm16_vm0, %v288_v38, %v303_v56  ;;  %853 = vmatprep.subr.bf16.mxu0 %v887_v36 }
 0x281   :  { %854 = vmatpush3.bf16.msra.mxu0 %v887_v36 }
 0x282   :  { %v275_v55 = vpop.permute.xlu1 %274  ;;  %855 = vmatprep.subr.bf16.mxu0 %v888_v41 }
 0x283   :  { %v283_v57 = vsel %vm16_vm0, %v260_v31, %v275_v55  ;;  %v891_v55 = vld [vmem:[%s1183_s1 + $0x88] sm:$0xff]  }
 0x284   :  { %v286_v58 = vsel %vm57_vm2, %v283_v57, %v279_v50  ;;  %v890_v50 = vld [vmem:[%s1183_s1 + $0x80] sm:$0xff]  }
 0x285   :  { %v318_v60 = vrot.slane %v286_v58, 7  ;;  %856 = vmatpush3.bf16.msra.mxu0 %v888_v41 }
 0x286   :  { %v307_v63 = vpop.permute.xlu1 %306  ;;  %857 = vmatprep.subr.bf16.mxu0 %v889_v48 }
 0x287   :  { %v313_v0 = vsel %vm57_vm2, %v309_v61, %v307_v63  ;;  %v314_v1 = vsel %vm57_vm2, %v311_v62, %v307_v63  ;;  %v319_v2 = vsel %vm91_vm3, %v317_v59, %v318_v60 }
 0x288   :  { %v322_v3 = vrot.slane %v313_v0, 7  ;;  %v323_v4 = vrot.slane %v314_v1, 7  ;;  %847 = vmatprep.mubr.msk.bf16.mxu1 %vm155_vm4, %v319_v2 }
 0x289   :  { %858 = vmatpush3.bf16.msra.mxu0 %v889_v48 }
 0x28a   :  { %v324_v5 = vsel %vm91_vm3, %v322_v3, %v323_v4  ;;  %859 = vmatprep.subr.bf16.mxu0 %v890_v50 }
 0x28b   :  { %848 = vmatmul.mubr.msk.bf16.vlgmr.msra.gmra.mrb[0].mxu1 %vm155_vm4, %v324_v5 }
 0x28d   :  { %860 = vmatpush3.bf16.msra.mxu0 %v890_v50 }
 0x28e   :  { %861 = vmatprep.subr.bf16.mxu0 %v891_v55 }
 0x291   :  { %862 = vmatpush3.bf16.msra.mxu0 %v891_v55 }
 0x35e   :  { %v849_v7 = vpop.f32.mrb[0].mxu1 }
 0x35f   :  { %v431_v8 = vadd.f32 %v849_v7, %v756_v6  ;;  %v422_v9 = vpop.f32.mrb[1].mxu1 }
 0x360   :  { %v423_v12 = vadd.f32 %v756_v6, %v422_v9  ;;  %v850_v13 = vpop.f32.mrb[2].mxu1 }
 0x361   :  { %v767_v14 = vmul.f32 -1.442695, %v431_v8  ;;  %v434_v16 = vadd.f32 %v850_v13, %v756_v6  ;;  %v425_v17 = vpop.f32.mrb[3].mxu1 }
 0x362   :  { %v765_v19 = vmul.f32 -1.442695, %v423_v12  ;;  %v426_v20 = vadd.f32 %v756_v6, %v425_v17 }
 0x363   :  { %908 = vpow2.f32 %v767_v14  ;;  %v768_v21 = vmul.f32 -1.442695, %v434_v16 }
 0x364   :  { %910 = vpow2.f32 %v765_v19  ;;  %v766_v22 = vmul.f32 -1.442695, %v426_v20 }
 0x365   :  { %912 = vpow2.f32 %v768_v21 }
 0x366   :  { %914 = vpow2.f32 %v766_v22 }
 0x36d   :  { %v909_v23 = vpop.eup %908 }
 0x36e   :  { %v911_v24 = vpop.eup %910  ;;  %v451_v28 = vadd.f32 1.0, %v909_v23 }
 0x36f   :  { %v913_v25 = vpop.eup %912  ;;  %v449_v26 = vadd.f32 1.0, %v911_v24 }
 0x370   :  { %v915_v27 = vpop.eup %914  ;;  %v452_v30 = vadd.f32 1.0, %v913_v25 }
 0x371   :  { %916 = vrcp.f32 %v449_v26  ;;  %v450_v29 = vadd.f32 1.0, %v915_v27 }
 0x373   :  { %918 = vrcp.f32 %v450_v29 }
 0x374   :  { %920 = vrcp.f32 %v451_v28 }
 0x375   :  { %922 = vrcp.f32 %v452_v30 }
 0x37b   :  { %v917_v31 = vpop.eup %916 }
 0x37c   :  { %465 = vrot.lane.b32.xlu0 %v917_v31, %s967_s8 }
 0x37d   :  { %v919_v32 = vpop.eup %918 }
 0x37e   :  { %467 = vrot.lane.b32.xlu1 %v919_v32, %s967_s8  ;;  %v921_v33 = vpop.eup %920 }
 0x37f   :  { %v923_v34 = vpop.eup %922 }
 0x380   :  { %469 = vrot.lane.b32.xlu0 %v921_v33, %s967_s8 }
 0x382   :  { %471 = vrot.lane.b32.xlu1 %v923_v34, %s967_s8 }
 0x3ee   :  { %v466_v37 = vpop.permute.xlu0 %465 }
 0x3ef   :  { %v477_v39 = vmul.f32 %v466_v37, %v423_v12 }
 0x3f0   :  { %v468_v38 = vpop.permute.xlu1 %467 }
 0x3f1   :  { %v478_v40 = vmul.f32 %v468_v38, %v426_v20 }
 0x3f2   :  { %v470_v42 = vpop.permute.xlu0 %469 }
 0x3f3   :  { %v481_v43 = vpack.c.bf16 %v478_v40, %v477_v39  ;;  %v479_v45 = vmul.f32 %v470_v42, %v431_v8 }
 0x3f4   :  { %v472_v44 = vpop.permute.xlu1 %471 }
 0x3f5   :  { %482 = vst.msk [vmem:[#allocation2 + $0x8] sm:$0xff] %vm16_vm0, %v481_v43  ;;  %v480_v46 = vmul.f32 %v472_v44, %v434_v16 }
 0x3f7   :  { %v483_v47 = vpack.c.bf16 %v480_v46, %v479_v45 }
 0x3f9   :  { %484 = vst.msk [vmem:[#allocation2 + $0x18] sm:$0xff] %vm16_vm0, %v483_v47 }
 0x3fc   :  { %v486_v49 = vld [vmem:[#allocation2 + $0x8] sm:$0xff] }
 0x3fd   :  { %v503_v51 = vrot.slane %v486_v49, 1  ;;  %v491_v52 = vshll.u32 %v486_v49, 16  ;;  %v495_v62 = vshrl.u32 %v486_v49, 16 }
 0x3ff   :  { %504 = vrot.lane.b32.xlu0 %v503_v51, %s965_s29  ;;  %v493_v53 = vrot.slane %v491_v52, 1 }
 0x400   :  { %v514_v54 = vld [vmem:[#allocation2 + $0x18] sm:$0xff] }
 0x401   :  { %v494_v56 = vsel %vm33_vm1, %v35_v15, %v493_v53  ;;  %v519_v57 = vshll.u32 %v514_v54, 16  ;;  %v523_v59 = vshrl.u32 %v514_v54, 16  ;;  %v497_v63 = vor.u32 %v495_v62, %v493_v53 }
 0x402   :  { %v531_v15 = vrot.slane %v514_v54, 1 }
 0x403   :  { %498 = vrot.lane.b32.xlu0 %v494_v56, %s966_s30  ;;  %v521_v58 = vrot.slane %v519_v57, 1 }
 0x405   :  { %v522_v60 = vsel %vm33_vm1, %v64_v18, %v521_v58  ;;  %v525_v61 = vor.u32 %v523_v59, %v521_v58 }
 0x406   :  { %526 = vrot.lane.b32.xlu1 %v522_v60, %s966_s30 }
 0x407   :  { %528 = vrot.lane.b32.xlu0 %v525_v61, %s966_s30 }
 0x40a   :  { %500 = vrot.lane.b32.xlu1 %v497_v63, %s966_s30 }
 0x40e   :  { %532 = vrot.lane.b32.xlu1 %v531_v15, %s965_s29 }
 0x471   :  { %v505_v0 = vpop.permute.xlu0 %504 }
 0x475   :  { %v499_v1 = vpop.permute.xlu0 %498 }
 0x476   :  { %v507_v3 = vsel %vm16_vm0, %v1018_v10, %v499_v1 }
 0x477   :  { %v511_v18 = vsel %vm57_vm2, %v507_v3, %v505_v0 }
 0x478   :  { %v527_v2 = vpop.permute.xlu1 %526  ;;  %v543_v8 = vrot.slane %v511_v18, 7 }
 0x479   :  { %v529_v5 = vpop.permute.xlu0 %528  ;;  %v535_v12 = vsel %vm16_vm0, %v1020_v11, %v527_v2  ;;  %v782_v11 = vld [vmem:[%s1184_s2 + $0x2] ss:$0 sm:$0xff]  ;;  %s968_s2 = smov [#allocation3]  }
 0x47a   :  { %v537_v13 = vsel %vm16_vm0, %v514_v54, %v529_v5  ;;  %s717_s30 = sshll.u32 %s968_s2, 4  ;;  %s718_s30 = int_to_ptr.vmem [resolvable:$true] %s717_s30 }
 0x47b   :  { %p945_p1 = scmp.lt.s32.totalorder %s718_s30, %s718_s30 }
 0x47c   :  { %v501_v4 = vpop.permute.xlu1 %500 }
 0x47d   :  { %v509_v6 = vsel %vm16_vm0, %v486_v49, %v501_v4 }
 0x47e   :  { %v512_v7 = vsel %vm57_vm2, %v509_v6, %v505_v0 }
 0x47f   :  { %v544_v9 = vrot.slane %v512_v7, 7 }
 0x480   :  { %v533_v14 = vpop.permute.xlu1 %532 }
 0x481   :  { %v539_v16 = vsel %vm57_vm2, %v535_v12, %v533_v14  ;;  %v540_v10 = vsel %vm57_vm2, %v537_v13, %v533_v14  ;;  %v545_v17 = vsel %vm91_vm3, %v543_v8, %v544_v9 }
 0x482   :  { %v548_v19 = vrot.slane %v539_v16, 7  ;;  %v549_v20 = vrot.slane %v540_v10, 7  ;;  %863 = vmatprep.mubr.msk.bf16.mxu0 %vm155_vm4, %v545_v17 }
 0x484   :  { %v550_v21 = vsel %vm91_vm3, %v548_v19, %v549_v20 }
 0x485   :  { %864 = vmatmul.mubr.msk.bf16.vlgmr.msra.gmra.mrb[4].mxu0 %vm155_vm4, %v550_v21 }
 0x558   :  { %v865_v22 = vpop.f32.mrb[4].mxu0 }
 0x559   :  { %v657_v23 = vadd.f32 %v865_v22, %v782_v11  ;;  %v648_v24 = vpop.f32.mrb[5].mxu0 }
 0x55a   :  { %v649_v25 = vadd.f32 %v782_v11, %v648_v24  ;;  %v866_v26 = vpop.f32.mrb[6].mxu0 }
 0x55b   :  { %v793_v27 = vmul.f32 -1.442695, %v657_v23  ;;  %v660_v28 = vadd.f32 %v866_v26, %v782_v11  ;;  %v651_v29 = vpop.f32.mrb[7].mxu0 }
 0x55c   :  { %v791_v30 = vmul.f32 -1.442695, %v649_v25  ;;  %v652_v31 = vadd.f32 %v782_v11, %v651_v29 }
 0x55d   :  { %924 = vpow2.f32 %v793_v27  ;;  %v794_v32 = vmul.f32 -1.442695, %v660_v28 }
 0x55e   :  { %926 = vpow2.f32 %v791_v30  ;;  %v792_v33 = vmul.f32 -1.442695, %v652_v31 }
 0x55f   :  { %928 = vpow2.f32 %v794_v32 }
 0x560   :  { %930 = vpow2.f32 %v792_v33 }
 0x567   :  { %v925_v34 = vpop.eup %924 }
 0x568   :  { %v927_v35 = vpop.eup %926  ;;  %v677_v39 = vadd.f32 1.0, %v925_v34 }
 0x569   :  { %v929_v36 = vpop.eup %928  ;;  %v675_v37 = vadd.f32 1.0, %v927_v35 }
 0x56a   :  { %v931_v38 = vpop.eup %930  ;;  %v678_v41 = vadd.f32 1.0, %v929_v36 }
 0x56b   :  { %932 = vrcp.f32 %v675_v37  ;;  %v676_v40 = vadd.f32 1.0, %v931_v38 }
 0x56d   :  { %934 = vrcp.f32 %v676_v40 }
 0x56e   :  { %936 = vrcp.f32 %v677_v39 }
 0x56f   :  { %938 = vrcp.f32 %v678_v41 }
 0x575   :  { %v933_v42 = vpop.eup %932 }
 0x576   :  { %691 = vrot.lane.b32.xlu0 %v933_v42, %s967_s8 }
 0x577   :  { %v935_v43 = vpop.eup %934 }
 0x578   :  { %693 = vrot.lane.b32.xlu1 %v935_v43, %s967_s8  ;;  %v937_v44 = vpop.eup %936 }
 0x579   :  { %v939_v45 = vpop.eup %938 }
 0x57a   :  { %695 = vrot.lane.b32.xlu0 %v937_v44, %s967_s8 }
 0x57c   :  { %697 = vrot.lane.b32.xlu1 %v939_v45, %s967_s8  ;;  %s940_s8 = scalar_lea.vmem %s718_s30, 512 }
 0x57d   :  { %p941_p0 = scmp.ne.s32.totalorder %s718_s30, %s940_s8  ;;  %p946_p2 = scmp.lt.s32.totalorder %s940_s8, %s940_s8 }
 0x57f   :  { %p947_p3 = por %p946_p2, %p945_p1 }
 0x581   :  { %p948_p4 = pnand %p947_p3, %p941_p0 }
 0x5e8   :  { %v692_v46 = vpop.permute.xlu0 %691 }
 0x5e9   :  { %v703_v47 = vmul.f32 %v692_v46, %v649_v25 }
 0x5ea   :  { %v694_v48 = vpop.permute.xlu1 %693 }
 0x5eb   :  { %707 = vst.msk [vmem:[#allocation3] sm:$0xff] %vm16_vm0, %v703_v47  ;;  %v704_v49 = vmul.f32 %v694_v48, %v652_v31 }
 0x5ec   :  { %v696_v50 = vpop.permute.xlu0 %695 }
 0x5ed   :  { %708 = vst.msk [vmem:[#allocation3 + $0x8] sm:$0xff] %vm16_vm0, %v704_v49  ;;  %v705_v51 = vmul.f32 %v696_v50, %v657_v23 }
 0x5ee   :  { %v698_v52 = vpop.permute.xlu1 %697 }
 0x5ef   :  { %710 = vst.msk [vmem:[#allocation3 + $0x10] sm:$0xff] %vm16_vm0, %v705_v51  ;;  %v706_v53 = vmul.f32 %v698_v52, %v660_v28 }
 0x5f1   :  { %711 = vst.msk [vmem:[#allocation3 + $0x18] sm:$0xff] %vm16_vm0, %v706_v53 }
 0x5f2   :  { %951 = shalt.err (!%p948_p4)
}
 0x5f3   :  { %s952_s12 = scalar_lea.hbm %s1185_s3, 512 }
 0x5f4   :  { %p953_p5 = scmp.ne.s32.totalorder %s1185_s3, %s952_s12  ;;  %p956_p6 = scmp.lt.u32.totalorder %s952_s12, %s1185_s3 }
 0x5f6   :  { %p958_p7 = pnand %p956_p6, %p953_p5 }
 0x5f8   :  { %961 = shalt.err (!%p958_p7)
}
 0x5f9   :  { %s969_s17 = smov 128   ;;  %s970_s18 = smov 8  }
 0x5fa   :  { %723 = dma.vmem_to_hbm [thread:$0]  %s718_s30, 512, %s1185_s3, [#allocation4], %s969_s17, %s969_s17, %s970_s18  }
 0x5fb   :  { %962 = dma.done.wait [#allocation4], 512  }
 0x5fc   :  { %963 = vsyncadd [#allocation4], 4294966784 }
 0x5fd   :  { %727 = vsyncpa [#allocation4], 1 }

</bundles_post_ra>
